<compile_context>
chip_gen: v6e
topology: v6e:2x2x1
jax: 0.10.0
libtpu: 0.0.40
codegen_flags: <defaults>
</compile_context>

<pallas_src>
import functools
import math

import jax
import jax.numpy as jnp
from jax.experimental import pallas as pl
from jax.experimental.pallas import tpu as pltpu


def _round_up(a, b):
    return -(-a // b) * b


def _lif_kernel(x_ref, o_ref, *, tau, threshold, v_reset, inv_tau):
    x = x_ref[...]
    if inv_tau is not None:
        # tau is a power of two -> multiply by 1/tau is bit-identical to divide.
        mem = v_reset + (x - v_reset) * inv_tau
    else:
        mem = v_reset + (x - v_reset) / tau
    # Heaviside spike (the surrogate_function only changes the backward pass).
    o_ref[...] = (mem > threshold).astype(o_ref.dtype)
    # TODO(synk): stateful membrane carry across timesteps (.mem) and reset()
    # are not part of the single-step forward's return value, so not emitted.


_LANE_CANDIDATES = (1024, 512, 256, 128)
_TILE_BYTES_BUDGET = 4 * 1024 * 1024  # ~4 MiB/tile -> 16 MiB resident (in+out, 2x buffered)


def lif_forward(x, *, tau=2.0, threshold=1.0, v_reset=0.0, donate_input=False):
    """Single-step LIF spike generation. x: any-shape float array (e.g. NCHW)."""
    orig_shape = x.shape
    dtype = x.dtype
    itemsize = jnp.dtype(dtype).itemsize
    n = x.size

    # ---- lane width: largest of {1024,512,256,128} that divides n (no pad);
    #      otherwise 128 lanes with < 128 elements of padding. ----
    lane = None
    for cand in _LANE_CANDIDATES:
        if n % cand == 0:
            lane = cand
            break
    if lane is None:
        lane = 128

    flat = x.reshape(-1)                       # bitcast for contiguous input
    n_padded = _round_up(n, lane)
    padded = n_padded != n
    if padded:
        # Only hit when n is not a multiple of 128 (rare for CNN activations).
        flat = jnp.pad(flat, (0, n_padded - n))
    rows = n_padded // lane
    x2d = flat.reshape(rows, lane)

    # ---- tile-size selection (dtype-aware, ~4 MiB tiles) ----
    sub = max(8, 32 // itemsize)               # 8 (f32) / 16 (bf16) / 32 (i8,fp8)
    max_rows = max(sub, (_TILE_BYTES_BUDGET // (lane * itemsize)) // sub * sub)

    if rows <= sub:
        tile_rows = rows                       # tiny input: block == full array
    else:
        # Aim for >= 4 grid steps so read-DMA / compute / writeback pipeline
        # and the v7x two-TC split have work to overlap.
        tile_rows = min(max_rows, max(sub, _round_up(pl.cdiv(rows, 4), sub)))
        grid_len = pl.cdiv(rows, tile_rows)
        if grid_len > 1 and grid_len % 2 == 1:
            # Prefer an even grid length so both TensorCores (v7x) get
            # balanced tile counts.
            alt = max(sub, _round_up(pl.cdiv(rows, grid_len + 1), sub))
            if pl.cdiv(rows, alt) % 2 == 0:
                tile_rows = alt
    grid_len = pl.cdiv(rows, tile_rows)

    tau_f = float(tau)
    pow2_tau = tau_f > 0.0 and math.frexp(tau_f)[0] == 0.5
    kernel = functools.partial(
        _lif_kernel,
        tau=tau_f,
        threshold=float(threshold),
        v_reset=float(v_reset),
        inv_tau=(1.0 / tau_f) if pow2_tau else None,
    )

    cost = pl.CostEstimate(
        flops=3 * n_padded,
        transcendentals=0,
        bytes_accessed=2 * n_padded * itemsize,
    )

    out2d = pl.pallas_call(
        kernel,
        out_shape=jax.ShapeDtypeStruct((rows, lane), dtype),
        grid=(grid_len,),
        in_specs=[pl.BlockSpec((tile_rows, lane), lambda i: (i, 0))],
        out_specs=pl.BlockSpec((tile_rows, lane), lambda i: (i, 0)),
        compiler_params=pltpu.CompilerParams(
            dimension_semantics=("parallel",),
            vmem_limit_bytes=32 * 1024 * 1024,
        ),
        cost_estimate=cost,
        input_output_aliases=({0: 0} if donate_input else {}),
    )(x2d)

    if padded:
        return out2d.reshape(-1)[:n].reshape(orig_shape)
    return out2d.reshape(orig_shape)


def lif_reference(x, *, tau=2.0, threshold=1.0, v_reset=0.0):
    mem = v_reset + (x - v_reset) / tau
    return (mem > threshold).astype(x.dtype)


if __name__ == "__main__":
    key = jax.random.PRNGKey(0)
    k0, k1, k2 = jax.random.split(key, 3)

    # 1) Small NCHW input consistent with the module (single-block path).
    x_small = jax.random.normal(k0, (2, 4, 16, 16), dtype=jnp.float32) * 3.0
    out_small = jax.block_until_ready(lif_forward(x_small))
    assert out_small.shape == x_small.shape and out_small.dtype == x_small.dtype
    assert jnp.array_equal(out_small, lif_reference(x_small)), "Pallas LIF mismatch (small)"

    # 2) Non-lane-aligned shape: exercises the 128-lane fallback + pad path.
    x_odd = jax.random.normal(k1, (2, 3, 17, 19), dtype=jnp.float32) * 3.0
    out_odd = jax.block_until_ready(lif_forward(x_odd))
    assert jnp.array_equal(out_odd, lif_reference(x_odd)), "Pallas LIF mismatch (odd)"

    # 3) Larger input: multi-tile pipelined grid (even grid, no pad/slice copies).
    x_big = jax.random.normal(k2, (4, 128, 64, 64), dtype=jnp.float32) * 3.0
    out_big = jax.block_until_ready(lif_forward(x_big))
    assert jnp.array_equal(out_big, lif_reference(x_big)), "Pallas LIF mismatch (big)"

    print("KERNEL_OK")
</pallas_src>

<mosaic_0001>
module attributes {stable_mosaic.version = 11 : i64} {
  func.func @_lif_kernel(%arg0: i32, %arg1: memref<2x1024xf32, #tpu.memory_space<vmem>>, %arg2: memref<2x1024xf32, #tpu.memory_space<vmem>>) attributes {dimension_semantics = [#tpu.dimension_semantics<parallel>], iteration_bounds = array<i64: 1>, scalar_prefetch = 0 : i64, scratch_operands = 0 : i64, tpu.core_type = #tpu.core_type<tc>, window_params = [{transform_indices = @transform_0, window_bounds = array<i64: 2, 1024>}, {transform_indices = @transform_1, window_bounds = array<i64: 2, 1024>}]} {
    %c0 = arith.constant 0 : index
    %c0_0 = arith.constant 0 : index
    %0 = vector.load %arg1[%c0, %c0_0] : memref<2x1024xf32, #tpu.memory_space<vmem>>, vector<2x1024xf32>
    %cst = arith.constant 0.000000e+00 : f32
    %1 = vector.broadcast %cst : f32 to vector<2x1024xf32>
    %2 = arith.subf %0, %1 : vector<2x1024xf32>
    %cst_1 = arith.constant 5.000000e-01 : f32
    %3 = vector.broadcast %cst_1 : f32 to vector<2x1024xf32>
    %4 = arith.mulf %2, %3 : vector<2x1024xf32>
    %cst_2 = arith.constant 0.000000e+00 : f32
    %5 = vector.broadcast %cst_2 : f32 to vector<2x1024xf32>
    %6 = arith.addf %5, %4 : vector<2x1024xf32>
    %cst_3 = arith.constant 1.000000e+00 : f32
    %7 = vector.broadcast %cst_3 : f32 to vector<2x1024xf32>
    %8 = arith.cmpf ogt, %6, %7 : vector<2x1024xf32>
    %9 = arith.extui %8 : vector<2x1024xi1> to vector<2x1024xi32>
    %10 = arith.sitofp %9 : vector<2x1024xi32> to vector<2x1024xf32>
    %c0_4 = arith.constant 0 : index
    %c0_5 = arith.constant 0 : index
    %11 = vector.load %arg2[%c0_4, %c0_5] : memref<2x1024xf32, #tpu.memory_space<vmem>>, vector<2x1024xf32>
    tpu.vector_store %arg2[%c0_4, %c0_5], %10 {strides = array<i32>} : memref<2x1024xf32, #tpu.memory_space<vmem>>, vector<2x1024xf32>,
    return
  }
  func.func @transform_0(%arg0: i32) -> (i32, i32) {
    %c0_i32 = arith.constant 0 : i32
    %c0_i32_0 = arith.constant 0 : i32
    return %arg0, %c0_i32 : i32, i32
  }
  func.func @transform_1(%arg0: i32) -> (i32, i32) {
    %c0_i32 = arith.constant 0 : i32
    %c0_i32_0 = arith.constant 0 : i32
    return %arg0, %c0_i32 : i32, i32
  }
}

</mosaic_0001>

<bundles_post_ra>
// kernel: tpu_custom_call.1
= control target key start
LH: loop header
LB: loop body
LE: loop exit
PB: predicated region body
PF: predicated region fallthrough
CT: control target
= control target key end

     0   :  { %6 = vsyncpa [#allocation3], 0  ;;  %s118_s0 = inlined_call_operand.hbm [shape: f32[2,1024], index: 0, kind: input, shape index: {}]   ;;  %s119_s1 = inlined_call_operand.hbm [shape: f32[2,1024], index: 1, kind: output, shape index: {}]  }
   0x1   :  { %7 = vsyncpa [#allocation4], 0  ;;  %s99_s6 = smov [#allocation2]  }
   0x2   :  { %s14_s7 = sshll.u32 %s99_s6, 4  ;;  %s15_s7 = int_to_ptr.vmem [resolvable:$true] %s14_s7 }
   0x3   :  { %s63_s8 = scalar_lea.vmem %s15_s7, 256  ;;  %p68_p1 = scmp.lt.s32.totalorder %s15_s7, %s15_s7 }
   0x4   :  { %p64_p0 = scmp.ne.s32.totalorder %s15_s7, %s63_s8  ;;  %p69_p2 = scmp.lt.s32.totalorder %s63_s8, %s63_s8 }
   0x6   :  { %p70_p3 = por %p69_p2, %p68_p1 }
   0x8   :  { %p71_p4 = pnand %p70_p3, %p64_p0 }
   0xa   :  { %74 = shalt.err (!%p71_p4)
}
   0xb   :  { %17 = dma.hbm_to_vmem [thread:$0]  %s118_s0, 256, %s15_s7, [#allocation3]  }
   0xc   :  { %95 = dma.done.wait [#allocation3], 256  }
   0xd   :  { %96 = vsyncadd [#allocation3], 4294967040  ;;  %v21_v0 = vld [vmem:[#allocation2] sm:$0xff]  ;;  %v22_v1 = vld [vmem:[#allocation2 + $0x8] sm:$0xff]  ;;  %s100_s11 = smov [#allocation5]   ;;  %v101_v4 = vmov 0.0  }
   0xe   :  { %s41_s12 = sshll.u32 %s100_s11, 4  ;;  %v23_v2 = vmul.f32 0.5, %v21_v0  ;;  %v24_v3 = vmul.f32 0.5, %v22_v1  ;;  %s42_s12 = int_to_ptr.vmem [resolvable:$true] %s41_s12 }
   0xf   :  { %s75_s13 = scalar_lea.vmem %s42_s12, 256  ;;  %p80_p6 = scmp.lt.s32.totalorder %s42_s12, %s42_s12 }
  0x10   :  { %vm27_vm0 = vcmp.gt.f32.partialorder %v23_v2, 1.0  ;;  %vm28_vm1 = vcmp.gt.f32.partialorder %v24_v3, 1.0  ;;  %p76_p5 = scmp.ne.s32.totalorder %s42_s12, %s75_s13  ;;  %p81_p7 = scmp.lt.s32.totalorder %s75_s13, %s75_s13 }
  0x11   :  { %v50_v5 = vsel %vm27_vm0, 1.0, %v101_v4  ;;  %v51_v6 = vsel %vm28_vm1, 1.0, %v101_v4 }
  0x12   :  { %33 = vst [vmem:[#allocation5] sm:$0xff] %v50_v5  ;;  %34 = vst [vmem:[#allocation5 + $0x8] sm:$0xff] %v51_v6  ;;  %p82_p8 = por %p81_p7, %p80_p6 }
  0x14   :  { %p83_p9 = pnand %p82_p8, %p76_p5 }
  0x16   :  { %86 = shalt.err (!%p83_p9)
}
  0x17   :  { %44 = dma.vmem_to_hbm [thread:$0]  %s42_s12, 256, %s119_s1, [#allocation4]  }
  0x18   :  { %97 = dma.done.wait [#allocation4], 256  }
  0x19   :  { %98 = vsyncadd [#allocation4], 4294967040 }
  0x1a   :  { %48 = vsyncpa [#allocation3], 1 }
  0x1b   :  { %49 = vsyncpa [#allocation4], 1 }

</bundles_post_ra>
